<compile_context>
chip_gen: v7x
topology: tpu7x:2x2x1
jax: 0.10.0
libtpu: 0.0.40
codegen_flags: <defaults>
</compile_context>

<pallas_src>
import functools

import jax
import jax.numpy as jnp
import numpy as np
from jax import lax
from jax.experimental import pallas as pl
from jax.experimental.pallas import tpu as pltpu

# ---------------- configuration (small, consistent with the module) ----------
B = 2          # batch
F = 8          # number of fields / sequence length
E = 32         # embedding_size
HEAD_NUM = 2   # head_num
D_HEAD = E // HEAD_NUM
SCALING = True
USE_RES = True
LN_EPS = 1e-6


def _self_attention_kernel(x_ref, w_ref, gb_ref, o_ref, *,
                           b_blk, f, e, head_num, scale, use_res, ln_eps):
    """One grid step = one block of `b_blk` batches.

    x_ref:  (b_blk, f, e)      inputs for this batch block
    w_ref:  (e, 4e)            fused [W_Query | W_Key | W_Value | W_Res]
    gb_ref: (2, e)             packed [gamma; beta]
    o_ref:  (b_blk, f, e)      output block
    """
    d = e // head_num

    # Single lane-dense (b_blk*f, e) x (e, 4e) MXU matmul for Q, K, V, residual.
    # f == 8 (one sublane tile), so the (b_blk, f, .) <-> (b_blk*f, .) reshapes
    # are layout-free sublane splits/merges.
    x2 = x_ref[...].reshape(b_blk * f, e)
    proj = jnp.dot(x2, w_ref[...], preferred_element_type=jnp.float32)
    proj3 = proj.reshape(b_blk, f, 4 * e if use_res else 3 * e)

    head_outs = []
    for h in range(head_num):
        qh = proj3[:, :, 0 * e + h * d: 0 * e + (h + 1) * d]   # (b_blk, f, d)
        kh = proj3[:, :, 1 * e + h * d: 1 * e + (h + 1) * d]   # (b_blk, f, d)
        vh = proj3[:, :, 2 * e + h * d: 2 * e + (h + 1) * d]   # (b_blk, f, d)

        # Batched contraction over the last dim (no explicit transpose).
        s = jnp.einsum('bqd,bkd->bqk', qh, kh,
                       preferred_element_type=jnp.float32)      # (b_blk, f, f)
        if scale != 1.0:
            s = s * scale

        m = jnp.max(s, axis=-1, keepdims=True)
        p = jnp.exp(s - m)
        denom = jnp.sum(p, axis=-1, keepdims=True)
        # EUP approximate reciprocal + one Newton-Raphson step (cheap VPU ops)
        # keeps the result within rtol=1e-4 / atol=1e-5 of an exact divide.
        r = pl.reciprocal(denom, approx=True)
        r = r * (2.0 - denom * r)
        p = p * r
        # attn_dropout -> identity (inference)

        head_outs.append(jnp.einsum('bqk,bkd->bqd', p, vh,
                                    preferred_element_type=jnp.float32))

    # Single lane concat per block; result stays in values (no scratch round-trip).
    result = head_outs[0] if head_num == 1 else jnp.concatenate(head_outs, axis=-1)
    # dropout -> identity (inference)

    if use_res:
        result = result + proj3[:, :, 3 * e: 4 * e]

    result = jnp.maximum(result, 0.0)                           # ReLU

    # LayerNorm over last dim e with learned gamma/beta.
    inv_e = 1.0 / e
    mean = jnp.sum(result, axis=-1, keepdims=True) * inv_e
    centered = result - mean
    var = jnp.sum(centered * centered, axis=-1, keepdims=True) * inv_e
    normed = centered * lax.rsqrt(var + ln_eps)

    gb = gb_ref[...]                                            # (2, e)
    o_ref[...] = normed * gb[0:1, :] + gb[1:2, :]


def fuse_params(w_query, w_key, w_value, w_res, gamma, beta):
    """One-time (init-time) parameter fusion; NOT part of the per-call path."""
    w_fused = jnp.concatenate([w_query, w_key, w_value, w_res], axis=1)  # (E, 4E)
    gb = jnp.stack([gamma, beta], axis=0)                                # (2, E)
    return w_fused, gb


@functools.partial(jax.jit,
                   static_argnames=("head_num", "scaling", "use_res", "batch_block"))
def self_attention_layer(x, w_fused, gb, *, head_num=HEAD_NUM, scaling=SCALING,
                         use_res=USE_RES, batch_block=None):
    """x: (B, F, E) float32; w_fused: (E, 4E); gb: (2, E). Returns (B, F, E)."""
    b, f, e = x.shape
    if batch_block is None:
        batch_block = b
    assert b % batch_block == 0
    d = e // head_num
    scale = (1.0 / (d ** 0.5)) if scaling else 1.0

    kernel = functools.partial(
        _self_attention_kernel,
        b_blk=batch_block, f=f, e=e, head_num=head_num,
        scale=scale, use_res=use_res, ln_eps=LN_EPS)

    return pl.pallas_call(
        kernel,
        out_shape=jax.ShapeDtypeStruct((b, f, e), jnp.float32),
        grid_spec=pltpu.PrefetchScalarGridSpec(
            num_scalar_prefetch=0,
            grid=(b // batch_block,),                              # batch-block grid
            in_specs=[
                pl.BlockSpec((batch_block, f, e), lambda i: (i, 0, 0)),     # x
                pl.BlockSpec((e, w_fused.shape[1]), lambda i: (0, 0)),      # fused W
                pl.BlockSpec((2, e), lambda i: (0, 0)),                     # [gamma; beta]
            ],
            out_specs=pl.BlockSpec((batch_block, f, e), lambda i: (i, 0, 0)),
        ),
        compiler_params=pltpu.CompilerParams(
            dimension_semantics=("parallel",)),                   # megacore on v7x for large B
    )(x, w_fused, gb)


def _reference(x, w_query, w_key, w_value, w_res, gamma, beta):
    """Pure-JAX reference mirroring the PyTorch forward (eval mode)."""
    q = jnp.einsum('bfe,eo->bfo', x, w_query)
    k = jnp.einsum('bfe,eo->bfo', x, w_key)
    v = jnp.einsum('bfe,eo->bfo', x, w_value)

    def split_heads(t):  # (B, F, E) -> (H, B, F, d)   (mirrors torch.stack(split))
        return jnp.stack(jnp.split(t, HEAD_NUM, axis=2), axis=0)

    qh, kh, vh = split_heads(q), split_heads(k), split_heads(v)
    scores = jnp.einsum('hbik,hbjk->hbij', qh, kh)
    if SCALING:
        scores = scores / (D_HEAD ** 0.5)
    attn = jax.nn.softmax(scores, axis=-1)
    out = jnp.einsum('hbij,hbjk->hbik', attn, vh)              # (H, B, F, d)
    out = jnp.concatenate(jnp.split(out, HEAD_NUM, axis=0), axis=-1)[0]  # (B, F, E)
    if USE_RES:
        out = out + jnp.einsum('bfe,eo->bfo', x, w_res)
    out = jnp.maximum(out, 0.0)
    mean = jnp.mean(out, axis=-1, keepdims=True)
    var = jnp.mean((out - mean) ** 2, axis=-1, keepdims=True)
    return (out - mean) / jnp.sqrt(var + LN_EPS) * gamma + beta


if __name__ == "__main__":
    key = jax.random.PRNGKey(0)
    kx, kq, kk, kv, kr, kg, kb = jax.random.split(key, 7)

    x = jax.random.normal(kx, (B, F, E), dtype=jnp.float32)
    # nn.init.normal_(tensor, mean=0.0, std=0.05) for every parameter
    w_query = 0.05 * jax.random.normal(kq, (E, E), dtype=jnp.float32)
    w_key = 0.05 * jax.random.normal(kk, (E, E), dtype=jnp.float32)
    w_value = 0.05 * jax.random.normal(kv, (E, E), dtype=jnp.float32)
    w_res = 0.05 * jax.random.normal(kr, (E, E), dtype=jnp.float32)
    gamma = 0.05 * jax.random.normal(kg, (E,), dtype=jnp.float32)
    beta = 0.05 * jax.random.normal(kb, (E,), dtype=jnp.float32)

    # One-time fusion at "init" (outside the per-call jitted path).
    w_fused, gb = fuse_params(w_query, w_key, w_value, w_res, gamma, beta)
    w_fused, gb = jax.block_until_ready((w_fused, gb))

    out = self_attention_layer(x, w_fused, gb)
    out = jax.block_until_ready(out)

    ref = _reference(x, w_query, w_key, w_value, w_res, gamma, beta)
    np.testing.assert_allclose(np.asarray(out), np.asarray(ref),
                               rtol=1e-4, atol=1e-5)

    print("KERNEL_OK")
</pallas_src>

<mosaic_0001>
module attributes {stable_mosaic.version = 11 : i64} {
  func.func @_self_attention_kernel(%arg0: i32, %arg1: memref<2x8x32xf32, #tpu.memory_space<vmem>>, %arg2: memref<32x128xf32, #tpu.memory_space<vmem>>, %arg3: memref<2x32xf32, #tpu.memory_space<vmem>>, %arg4: memref<2x8x32xf32, #tpu.memory_space<vmem>>) attributes {dimension_semantics = [#tpu.dimension_semantics<parallel>], iteration_bounds = array<i64: 1>, scalar_prefetch = 0 : i64, scratch_operands = 0 : i64, tpu.core_type = #tpu.core_type<tc>, window_params = [{transform_indices = @transform_0, window_bounds = array<i64: 2, 8, 32>}, {pipeline_mode = #tpu.pipeline_mode<synchronous>, transform_indices = @transform_1, window_bounds = array<i64: 32, 128>}, {pipeline_mode = #tpu.pipeline_mode<synchronous>, transform_indices = @transform_2, window_bounds = array<i64: 2, 32>}, {transform_indices = @transform_3, window_bounds = array<i64: 2, 8, 32>}]} {
    %c0 = arith.constant 0 : index
    %c0_0 = arith.constant 0 : index
    %c0_1 = arith.constant 0 : index
    %0 = vector.load %arg1[%c0, %c0_0, %c0_1] : memref<2x8x32xf32, #tpu.memory_space<vmem>>, vector<2x8x32xf32>
    %1 = vector.shape_cast %0 : vector<2x8x32xf32> to vector<16x32xf32>
    %c0_2 = arith.constant 0 : index
    %c0_3 = arith.constant 0 : index
    %2 = vector.load %arg2[%c0_2, %c0_3] : memref<32x128xf32, #tpu.memory_space<vmem>>, vector<32x128xf32>
    %cst = arith.constant dense<0.000000e+00> : vector<16x128xf32>
    %3 = tpu.matmul %1, %2, %cst {dimension_numbers = #tpu.dot_dimension_numbers<[1], [0], [0], [1], [0, 0, 1, 1], [], []>} : vector<16x32xf32>, vector<32x128xf32>, vector<16x128xf32> -> vector<16x128xf32>
    %4 = vector.shape_cast %3 : vector<16x128xf32> to vector<2x8x128xf32>
    %5 = vector.extract_strided_slice %4 {offsets = [0, 0, 0], sizes = [2, 8, 16], strides = [1, 1, 1]} : vector<2x8x128xf32> to vector<2x8x16xf32>
    %6 = vector.extract_strided_slice %4 {offsets = [0, 0, 32], sizes = [2, 8, 16], strides = [1, 1, 1]} : vector<2x8x128xf32> to vector<2x8x16xf32>
    %7 = vector.extract_strided_slice %4 {offsets = [0, 0, 64], sizes = [2, 8, 16], strides = [1, 1, 1]} : vector<2x8x128xf32> to vector<2x8x16xf32>
    "tpu.trace_start"() <{level = 10 : i32, message = "bqd,bkd->bqk"}> : () -> ()
    %cst_4 = arith.constant dense<0.000000e+00> : vector<2x8x8xf32>
    %8 = tpu.matmul %5, %6, %cst_4 {dimension_numbers = #tpu.dot_dimension_numbers<[2], [2], [1], [1], [0, 0, 0, 1, 1, 1], [0], [0]>} : vector<2x8x16xf32>, vector<2x8x16xf32>, vector<2x8x8xf32> -> vector<2x8x8xf32>
    "tpu.trace_stop"() : () -> ()
    %cst_5 = arith.constant 2.500000e-01 : f32
    %9 = vector.broadcast %cst_5 : f32 to vector<2x8x8xf32>
    %10 = arith.mulf %8, %9 : vector<2x8x8xf32>
    %cst_6 = arith.constant dense<0xFF800000> : vector<2x8xf32>
    %11 = vector.multi_reduction <maximumf>, %10, %cst_6 [2] : vector<2x8x8xf32> to vector<2x8xf32>
    %12 = vector.shape_cast %11 : vector<2x8xf32> to vector<2x8x1xf32>
    %13 = vector.broadcast %12 : vector<2x8x1xf32> to vector<2x8x8xf32>
    %14 = arith.subf %10, %13 : vector<2x8x8xf32>
    %15 = math.exp %14 : vector<2x8x8xf32>
    %cst_7 = arith.constant dense<0.000000e+00> : vector<2x8xf32>
    %16 = vector.multi_reduction <add>, %15, %cst_7 [2] : vector<2x8x8xf32> to vector<2x8xf32>
    %17 = vector.shape_cast %16 : vector<2x8xf32> to vector<2x8x1xf32>
    %18 = tpu.reciprocal %17 {approx = true} : vector<2x8x1xf32> -> vector<2x8x1xf32>
    %19 = arith.mulf %17, %18 : vector<2x8x1xf32>
    %cst_8 = arith.constant 2.000000e+00 : f32
    %20 = vector.broadcast %cst_8 : f32 to vector<2x8x1xf32>
    %21 = arith.subf %20, %19 : vector<2x8x1xf32>
    %22 = arith.mulf %18, %21 : vector<2x8x1xf32>
    %23 = vector.broadcast %22 : vector<2x8x1xf32> to vector<2x8x8xf32>
    %24 = arith.mulf %15, %23 : vector<2x8x8xf32>
    "tpu.trace_start"() <{level = 10 : i32, message = "bqk,bkd->bqd"}> : () -> ()
    %cst_9 = arith.constant dense<0.000000e+00> : vector<2x8x16xf32>
    %25 = tpu.matmul %24, %7, %cst_9 {dimension_numbers = #tpu.dot_dimension_numbers<[2], [1], [1], [2], [0, 0, 0, 1, 1, 2], [0], [0]>} : vector<2x8x8xf32>, vector<2x8x16xf32>, vector<2x8x16xf32> -> vector<2x8x16xf32>
    "tpu.trace_stop"() : () -> ()
    %26 = vector.extract_strided_slice %4 {offsets = [0, 0, 16], sizes = [2, 8, 16], strides = [1, 1, 1]} : vector<2x8x128xf32> to vector<2x8x16xf32>
    %27 = vector.extract_strided_slice %4 {offsets = [0, 0, 48], sizes = [2, 8, 16], strides = [1, 1, 1]} : vector<2x8x128xf32> to vector<2x8x16xf32>
    %28 = vector.extract_strided_slice %4 {offsets = [0, 0, 80], sizes = [2, 8, 16], strides = [1, 1, 1]} : vector<2x8x128xf32> to vector<2x8x16xf32>
    "tpu.trace_start"() <{level = 10 : i32, message = "bqd,bkd->bqk"}> : () -> ()
    %cst_10 = arith.constant dense<0.000000e+00> : vector<2x8x8xf32>
    %29 = tpu.matmul %26, %27, %cst_10 {dimension_numbers = #tpu.dot_dimension_numbers<[2], [2], [1], [1], [0, 0, 0, 1, 1, 1], [0], [0]>} : vector<2x8x16xf32>, vector<2x8x16xf32>, vector<2x8x8xf32> -> vector<2x8x8xf32>
    "tpu.trace_stop"() : () -> ()
    %cst_11 = arith.constant 2.500000e-01 : f32
    %30 = vector.broadcast %cst_11 : f32 to vector<2x8x8xf32>
    %31 = arith.mulf %29, %30 : vector<2x8x8xf32>
    %cst_12 = arith.constant dense<0xFF800000> : vector<2x8xf32>
    %32 = vector.multi_reduction <maximumf>, %31, %cst_12 [2] : vector<2x8x8xf32> to vector<2x8xf32>
    %33 = vector.shape_cast %32 : vector<2x8xf32> to vector<2x8x1xf32>
    %34 = vector.broadcast %33 : vector<2x8x1xf32> to vector<2x8x8xf32>
    %35 = arith.subf %31, %34 : vector<2x8x8xf32>
    %36 = math.exp %35 : vector<2x8x8xf32>
    %cst_13 = arith.constant dense<0.000000e+00> : vector<2x8xf32>
    %37 = vector.multi_reduction <add>, %36, %cst_13 [2] : vector<2x8x8xf32> to vector<2x8xf32>
    %38 = vector.shape_cast %37 : vector<2x8xf32> to vector<2x8x1xf32>
    %39 = tpu.reciprocal %38 {approx = true} : vector<2x8x1xf32> -> vector<2x8x1xf32>
    %40 = arith.mulf %38, %39 : vector<2x8x1xf32>
    %cst_14 = arith.constant 2.000000e+00 : f32
    %41 = vector.broadcast %cst_14 : f32 to vector<2x8x1xf32>
    %42 = arith.subf %41, %40 : vector<2x8x1xf32>
    %43 = arith.mulf %39, %42 : vector<2x8x1xf32>
    %44 = vector.broadcast %43 : vector<2x8x1xf32> to vector<2x8x8xf32>
    %45 = arith.mulf %36, %44 : vector<2x8x8xf32>
    "tpu.trace_start"() <{level = 10 : i32, message = "bqk,bkd->bqd"}> : () -> ()
    %cst_15 = arith.constant dense<0.000000e+00> : vector<2x8x16xf32>
    %46 = tpu.matmul %45, %28, %cst_15 {dimension_numbers = #tpu.dot_dimension_numbers<[2], [1], [1], [2], [0, 0, 0, 1, 1, 2], [0], [0]>} : vector<2x8x8xf32>, vector<2x8x16xf32>, vector<2x8x16xf32> -> vector<2x8x16xf32>
    "tpu.trace_stop"() : () -> ()
    %47 = tpu.concatenate %25, %46 in 2 : vector<2x8x16xf32>, vector<2x8x16xf32> -> vector<2x8x32xf32>
    %48 = vector.extract_strided_slice %4 {offsets = [0, 0, 96], sizes = [2, 8, 32], strides = [1, 1, 1]} : vector<2x8x128xf32> to vector<2x8x32xf32>
    %49 = arith.addf %47, %48 : vector<2x8x32xf32>
    %cst_16 = arith.constant 0.000000e+00 : f32
    %50 = vector.broadcast %cst_16 : f32 to vector<2x8x32xf32>
    %51 = arith.maximumf %49, %50 : vector<2x8x32xf32>
    %cst_17 = arith.constant dense<0.000000e+00> : vector<2x8xf32>
    %52 = vector.multi_reduction <add>, %51, %cst_17 [2] : vector<2x8x32xf32> to vector<2x8xf32>
    %53 = vector.shape_cast %52 : vector<2x8xf32> to vector<2x8x1xf32>
    %cst_18 = arith.constant 3.125000e-02 : f32
    %54 = vector.broadcast %cst_18 : f32 to vector<2x8x1xf32>
    %55 = arith.mulf %53, %54 : vector<2x8x1xf32>
    %56 = vector.broadcast %55 : vector<2x8x1xf32> to vector<2x8x32xf32>
    %57 = arith.subf %51, %56 : vector<2x8x32xf32>
    %58 = arith.mulf %57, %57 : vector<2x8x32xf32>
    %cst_19 = arith.constant dense<0.000000e+00> : vector<2x8xf32>
    %59 = vector.multi_reduction <add>, %58, %cst_19 [2] : vector<2x8x32xf32> to vector<2x8xf32>
    %60 = vector.shape_cast %59 : vector<2x8xf32> to vector<2x8x1xf32>
    %cst_20 = arith.constant 3.125000e-02 : f32
    %61 = vector.broadcast %cst_20 : f32 to vector<2x8x1xf32>
    %62 = arith.mulf %60, %61 : vector<2x8x1xf32>
    %cst_21 = arith.constant 9.99999997E-7 : f32
    %63 = vector.broadcast %cst_21 : f32 to vector<2x8x1xf32>
    %64 = arith.addf %62, %63 : vector<2x8x1xf32>
    %65 = math.rsqrt %64 : vector<2x8x1xf32>
    %66 = vector.broadcast %65 : vector<2x8x1xf32> to vector<2x8x32xf32>
    %67 = arith.mulf %57, %66 : vector<2x8x32xf32>
    %c0_22 = arith.constant 0 : index
    %c0_23 = arith.constant 0 : index
    %68 = vector.load %arg3[%c0_22, %c0_23] : memref<2x32xf32, #tpu.memory_space<vmem>>, vector<2x32xf32>
    %69 = vector.extract_strided_slice %68 {offsets = [0, 0], sizes = [1, 32], strides = [1, 1]} : vector<2x32xf32> to vector<1x32xf32>
    %70 = vector.shape_cast %69 : vector<1x32xf32> to vector<1x1x32xf32>
    %71 = vector.broadcast %70 : vector<1x1x32xf32> to vector<2x8x32xf32>
    %72 = arith.mulf %67, %71 : vector<2x8x32xf32>
    %73 = vector.extract_strided_slice %68 {offsets = [1, 0], sizes = [1, 32], strides = [1, 1]} : vector<2x32xf32> to vector<1x32xf32>
    %74 = vector.shape_cast %73 : vector<1x32xf32> to vector<1x1x32xf32>
    %75 = vector.broadcast %74 : vector<1x1x32xf32> to vector<2x8x32xf32>
    %76 = arith.addf %72, %75 : vector<2x8x32xf32>
    %c0_24 = arith.constant 0 : index
    %c0_25 = arith.constant 0 : index
    %c0_26 = arith.constant 0 : index
    %77 = vector.load %arg4[%c0_24, %c0_25, %c0_26] : memref<2x8x32xf32, #tpu.memory_space<vmem>>, vector<2x8x32xf32>
    tpu.vector_store %arg4[%c0_24, %c0_25, %c0_26], %76 {strides = array<i32>} : memref<2x8x32xf32, #tpu.memory_space<vmem>>, vector<2x8x32xf32>,
    return
  }
  func.func @transform_0(%arg0: i32) -> (i32, i32, i32) {
    %c0_i32 = arith.constant 0 : i32
    %c0_i32_0 = arith.constant 0 : i32
    %c0_i32_1 = arith.constant 0 : i32
    return %arg0, %c0_i32, %c0_i32_0 : i32, i32, i32
  }
  func.func @transform_1(%arg0: i32) -> (i32, i32) {
    %c0_i32 = arith.constant 0 : i32
    %c0_i32_0 = arith.constant 0 : i32
    %c0_i32_1 = arith.constant 0 : i32
    return %c0_i32, %c0_i32_0 : i32, i32
  }
  func.func @transform_2(%arg0: i32) -> (i32, i32) {
    %c0_i32 = arith.constant 0 : i32
    %c0_i32_0 = arith.constant 0 : i32
    %c0_i32_1 = arith.constant 0 : i32
    return %c0_i32, %c0_i32_0 : i32, i32
  }
  func.func @transform_3(%arg0: i32) -> (i32, i32, i32) {
    %c0_i32 = arith.constant 0 : i32
    %c0_i32_0 = arith.constant 0 : i32
    %c0_i32_1 = arith.constant 0 : i32
    return %arg0, %c0_i32, %c0_i32_0 : i32, i32, i32
  }
}

</mosaic_0001>

<bundles_post_ra>
// kernel: self_attention_layer.1
= control target key start
LH: loop header
LB: loop body
LE: loop exit
PB: predicated region body
PF: predicated region fallthrough
CT: control target
= control target key end

     0   :  { %8 = vsyncpa [#allocation3], 0  ;;  %s1249_s0 = inlined_call_operand.hbm [shape: f32[2,8,32], index: 0, kind: input, shape index: {}]   ;;  %s1250_s1 = inlined_call_operand.hbm [shape: f32[32,128], index: 1, kind: input, shape index: {}]   ;;  %s1251_s2 = inlined_call_operand.vmem [shape: f32[2,32], index: 2, kind: input, shape index: {}]   ;;  %s1252_s3 = inlined_call_operand.hbm [shape: f32[2,8,32], index: 3, kind: output, shape index: {}]  }
   0x1   :  { %9 = vsyncpa [#allocation6], 0 }
   0x2   :  { %10 = vsyncpa [#allocation4], 0  ;;  %s1087_s12 = smov [#allocation2]   ;;  %s1015_s16 = scalar_lea.hbm %s1249_s0, 256 }
   0x3   :  { %s16_s13 = sshll.u32 %s1087_s12, 4  ;;  %p1016_p0 = scmp.ne.s32.totalorder %s1249_s0, %s1015_s16  ;;  %s17_s13 = int_to_ptr.vmem [resolvable:$true] %s16_s13 }
   0x4   :  { %p1019_p1 = scmp.lt.u32.totalorder %s1015_s16, %s1249_s0 }
   0x6   :  { %p1021_p2 = pnand %p1019_p1, %p1016_p0 }
   0x8   :  { %1024 = shalt.err (!%p1021_p2)
}
   0x9   :  { %s1025_s21 = scalar_lea.vmem %s17_s13, 256  ;;  %p1030_p4 = scmp.lt.s32.totalorder %s17_s13, %s17_s13 }
   0xa   :  { %p1026_p3 = scmp.ne.s32.totalorder %s17_s13, %s1025_s21  ;;  %p1031_p5 = scmp.lt.s32.totalorder %s1025_s21, %s1025_s21 }
   0xc   :  { %p1032_p6 = por %p1031_p5, %p1030_p4 }
   0xe   :  { %p1033_p7 = pnand %p1032_p6, %p1026_p3 }
  0x10   :  { %1036 = shalt.err (!%p1033_p7)
}
  0x11   :  { %s1088_s22 = smov 128   ;;  %s1089_s23 = smov 8  }
  0x12   :  { %22 = dma.hbm_to_vmem [thread:$0]  %s1249_s0, 256, %s17_s13, [#allocation3], %s1088_s22, %s1088_s22, %s1089_s23  }
  0x13   :  { %s1090_s26 = smov [#allocation5]   ;;  %s1037_s30 = scalar_lea.hbm %s1250_s1, 512 }
  0x14   :  { %s28_s27 = sshll.u32 %s1090_s26, 4  ;;  %p1038_p8 = scmp.ne.s32.totalorder %s1250_s1, %s1037_s30  ;;  %s29_s27 = int_to_ptr.vmem [resolvable:$true] %s28_s27 }
  0x15   :  { %p1041_p9 = scmp.lt.u32.totalorder %s1037_s30, %s1250_s1 }
  0x17   :  { %p1043_p10 = pnand %p1041_p9, %p1038_p8 }
  0x19   :  { %1046 = shalt.err (!%p1043_p10)
}
  0x1a   :  { %s1047_s8 = scalar_lea.vmem %s29_s27, 512  ;;  %p1052_p12 = scmp.lt.s32.totalorder %s29_s27, %s29_s27 }
  0x1b   :  { %p1048_p11 = scmp.ne.s32.totalorder %s29_s27, %s1047_s8  ;;  %p1053_p13 = scmp.lt.s32.totalorder %s1047_s8, %s1047_s8 }
  0x1d   :  { %p1054_p0 = por %p1053_p13, %p1052_p12 }
  0x1f   :  { %p1055_p1 = pnand %p1054_p0, %p1048_p11 }
  0x21   :  { %1058 = shalt.err (!%p1055_p1)
}
  0x22   :  { %34 = dma.hbm_to_vmem [thread:$0]  %s1250_s1, 512, %s29_s27, [#allocation6], %s1088_s22, %s1088_s22, %s1089_s23  }
  0x23   :  { %1081 = dma.done.wait [#allocation3], 256  }
  0x24   :  { %1082 = vsyncadd [#allocation3], 4294967040 }
  0x25   :  { %1083 = dma.done.wait [#allocation6], 512  }
  0x26   :  { %1084 = vsyncadd [#allocation6], 4294966784  ;;  %vm49_vm0 = vcmask 261120   ;;  %v45_v0 = vld [vmem:[#allocation5] sm:$0xff]  ;;  %v46_v1 = vld [vmem:[#allocation5 + $0x8] sm:$0xff]  ;;  %v1091_v8 = vmov 0.0  }
  0x27   :  { %v47_v2 = vld [vmem:[#allocation5 + $0x10] sm:$0xff]  ;;  %v973_v3 = vpack.c.bf16 %v46_v1, %v45_v0  ;;  %v48_v4 = vld [vmem:[#allocation5 + $0x18] sm:$0xff]  ;;  %933 = vmatprep.subr.mxu1 %v1091_v8  ;;  %vm1092_vm1 = vmmov 0   ;;  %s1093_s1 = smov 96   ;;  %vm134_vm2 = vcmask 130048   ;;  %vm288_vm3 = vcmask 64512  }
  0x28   :  { %v43_v5 = vld [vmem:[#allocation2] sm:$0xff]  ;;  %v977_v6 = vpack.c.bf16 %v48_v4, %v47_v2  ;;  %v44_v7 = vld [vmem:[#allocation2 + $0x8] sm:$0xff]  ;;  %935 = vmatprep.mubr.msk.f32.mxu1 %vm1092_vm1, %v1091_v8  ;;  %s1094_s10 = smov 64   ;;  %s1095_s11 = smov 80  }
  0x29   :  { %930 = vmatprep.mubr.msk.f32.mxu0 %vm49_vm0, %v43_v5  ;;  %974 = vmatprep.subr.bf16.mxu0 %v973_v3  ;;  %s1096_s12 = smov 112   ;;  %s1097_s13 = smov 48  }
  0x2a   :  { %976 = vmatpush3.bf16.msra.mxu0 %v973_v3  ;;  %s1098_s14 = smov 32   ;;  %s1099_s15 = smov 16  }
  0x2b   :  { %978 = vmatprep.subr.bf16.mxu0 %v977_v6  ;;  %s1100_s18 = smov [#allocation7]  }
  0x2c   :  { %s873_s19 = sshll.u32 %s1100_s18, 4  ;;  %s874_s19 = int_to_ptr.vmem [resolvable:$true] %s873_s19 }
  0x2d   :  { %p1064_p3 = scmp.lt.s32.totalorder %s874_s19, %s874_s19 }
  0x2e   :  { %980 = vmatpush3.bf16.msra.mxu0 %v977_v6 }
  0x2f   :  { %943 = vmatprep.subr.mxu0 %v1091_v8 }
  0x31   :  { %931 = vmatmul.mubr.msk.f32.vlgmr.msra.gmra.mrb[0].mxu0 %vm49_vm0, %v44_v7 }
  0x32   :  { %945 = vmatprep.mubr.msk.f32.mxu0 %vm1092_vm1, %v1091_v8 }
 0x104   :  { %v1159_v9 = vpop.f32.mrb[0].mxu0 }
 0x105   :  { %v1161_v10 = vpop.f32.mrb[1].mxu0 }
 0x106   :  { %132 = vrot.lane.b32.xlu0 %v1161_v10, %s1093_s1 }
 0x10a   :  { %210 = vrot.lane.b32.xlu0 %v1159_v9, %s1093_s1 }
 0x178   :  { %v133_v11 = vpop.permute.xlu0 %132 }
 0x179   :  { %934 = vmatpush3.xpose.msk.msra.mxu1 %vm134_vm2, %v133_v11 }
 0x17a   :  { %938 = vmatprep.subr.mxu1 %v1091_v8 }
 0x17c   :  { %936 = vmatmul.mubr.msk.f32.vlgmr.msra.gmra.mrb[0].mxu1 %vm134_vm2, %v1161_v10  ;;  %v211_v12 = vpop.permute.xlu0 %210 }
 0x17d   :  { %939 = vmatpush3.xpose.msk.msra.mxu1 %vm134_vm2, %v211_v12  ;;  %940 = vmatprep.mubr.msk.f32.mxu1 %vm1092_vm1, %v1091_v8 }
 0x17e   :  { %948 = vmatprep.subr.mxu1 %v1091_v8 }
 0x180   :  { %941 = vmatmul.mubr.msk.f32.vlgmr.msra.gmra.mrb[2].mxu1 %vm134_vm2, %v1159_v9 }
 0x181   :  { %950 = vmatprep.mubr.msk.f32.mxu1 %vm1092_vm1, %v1091_v8 }
 0x24f   :  { %v205_v13 = vpop.f32.mrb[0].mxu1 }
 0x250   :  { %v286_v14 = vmul.f32 0.25, %v205_v13  ;;  %v937_v15 = vpop.f32.mrb[1].mxu1 }
 0x252   :  { %v289_v16 = vsel %vm288_vm3, %v286_v14, -inf }
 0x253   :  { %290 = vmax.xlane.f32.xlu1 %v289_v16  ;;  %v282_v17 = vpop.f32.mrb[2].mxu1 }
 0x254   :  { %v287_v18 = vmul.f32 0.25, %v282_v17  ;;  %v942_v19 = vpop.f32.mrb[3].mxu1 }
 0x256   :  { %v292_v20 = vsel %vm288_vm3, %v287_v18, -inf }
 0x257   :  { %293 = vmax.xlane.f32.xlu1 %v292_v20 }
 0x268   :  { %317 = vrot.lane.b32.xlu1 %v1161_v10, %s1094_s10 }
 0x26c   :  { %393 = vrot.lane.b32.xlu1 %v1159_v9, %s1094_s10 }
 0x270   :  { %471 = vrot.lane.b32.xlu1 %v1161_v10, %s1095_s11 }
 0x2e0   :  { %v291_v21 = vpop.xlane.xlu1 %290 }
 0x2e1   :  { %v295_v22 = vsub.f32 %v286_v14, %v291_v21 }
 0x2e3   :  { %v297_v23 = vmul.f32 1.442695, %v295_v22 }
 0x2e4   :  { %v294_v24 = vpop.xlane.xlu1 %293 }
 0x2e5   :  { %995 = vpow2.f32 %v297_v23  ;;  %v296_v25 = vsub.f32 %v287_v18, %v294_v24 }
 0x2e7   :  { %v299_v26 = vmul.f32 1.442695, %v296_v25 }
 0x2e8   :  { %v318_v27 = vpop.permute.xlu1 %317 }
 0x2e9   :  { %997 = vpow2.f32 %v299_v26  ;;  %944 = vmatpush3.msra.mxu0 %v318_v27 }
 0x2ea   :  { %953 = vmatprep.subr.mxu0 %v1091_v8 }
 0x2ec   :  { %v394_v28 = vpop.permute.xlu1 %393 }
 0x2ed   :  { %949 = vmatpush3.msra.mxu1 %v394_v28 }
 0x2ee   :  { %958 = vmatprep.subr.mxu1 %v1091_v8 }
 0x2ef   :  { %v996_v29 = vpop.eup %995 }
 0x2f0   :  { %v301_v30 = vsel %vm288_vm3, %v996_v29, 0.0  ;;  %v472_v33 = vpop.permute.xlu1 %471 }
 0x2f1   :  { %302 = vadd.xlane.f32.xlu0 %v301_v30 }
 0x2f3   :  { %v998_v31 = vpop.eup %997 }
 0x2f4   :  { %v304_v32 = vsel %vm288_vm3, %v998_v31, 0.0 }
 0x2f5   :  { %305 = vadd.xlane.f32.xlu1 %v304_v32 }
 0x306   :  { %549 = vrot.lane.b32.xlu1 %v1159_v9, %s1095_s11 }
 0x307   :  { %469 = vrot.lane.b32.xlu0 %v1161_v10, %s1096_s12 }
 0x30a   :  { %547 = vrot.lane.b32.xlu1 %v1159_v9, %s1096_s12 }
 0x37e   :  { %v303_v34 = vpop.xlane.xlu0 %302 }
 0x37f   :  { %999 = vrcp.f32 %v303_v34 }
 0x382   :  { %v306_v35 = vpop.xlane.xlu1 %305  ;;  %v470_v47 = vpop.permute.xlu0 %469 }
 0x383   :  { %1001 = vrcp.f32 %v306_v35 }
 0x386   :  { %v550_v45 = vpop.permute.xlu1 %549 }
 0x389   :  { %v1000_v36 = vpop.eup %999 }
 0x38a   :  { %v309_v37 = vmul.f32 %v1000_v36, %v303_v34  ;;  %v548_v48 = vpop.permute.xlu1 %547 }
 0x38c   :  { %v311_v38 = vsub.f32 2.0, %v309_v37 }
 0x38d   :  { %v1002_v39 = vpop.eup %1001 }
 0x38e   :  { %v313_v40 = vmul.f32 %v1000_v36, %v311_v38  ;;  %v310_v41 = vmul.f32 %v1002_v39, %v306_v35 }
 0x390   :  { %v315_v42 = vmul.f32 %v996_v29, %v313_v40  ;;  %v312_v43 = vsub.f32 2.0, %v310_v41 }
 0x392   :  { %v314_v44 = vmul.f32 %v1002_v39, %v312_v43  ;;  %946 = vmatmul.mubr.msk.f32.vlgmr.msra.gmra.mrb[2].mxu0 %vm288_vm3, %v315_v42 }
 0x393   :  { %954 = vmatpush3.xpose.msk.msra.mxu0 %vm134_vm2, %v472_v33  ;;  %955 = vmatprep.mubr.msk.f32.mxu0 %vm1092_vm1, %v1091_v8 }
 0x394   :  { %v316_v46 = vmul.f32 %v998_v31, %v314_v44  ;;  %963 = vmatprep.subr.mxu0 %v1091_v8 }
 0x396   :  { %951 = vmatmul.mubr.msk.f32.vlgmr.msra.gmra.mrb[4].mxu1 %vm288_vm3, %v316_v46  ;;  %956 = vmatmul.mubr.msk.f32.vlgmr.msra.gmra.mrb[4].mxu0 %vm134_vm2, %v470_v47 }
 0x397   :  { %959 = vmatpush3.xpose.msk.msra.mxu1 %vm134_vm2, %v550_v45  ;;  %960 = vmatprep.mubr.msk.f32.mxu1 %vm1092_vm1, %v1091_v8 }
 0x398   :  { %968 = vmatprep.subr.mxu1 %v1091_v8  ;;  %965 = vmatprep.mubr.msk.f32.mxu0 %vm1092_vm1, %v1091_v8 }
 0x39a   :  { %961 = vmatmul.mubr.msk.f32.vlgmr.msra.gmra.mrb[6].mxu1 %vm134_vm2, %v548_v48 }
 0x39b   :  { %970 = vmatprep.mubr.msk.f32.mxu1 %vm1092_vm1, %v1091_v8 }
 0x465   :  { %v1205_v49 = vpop.f32.mrb[2].mxu0 }
 0x466   :  { %v947_v50 = vpop.f32.mrb[3].mxu0 }
 0x469   :  { %v1207_v51 = vpop.f32.mrb[4].mxu1  ;;  %v543_v52 = vpop.f32.mrb[4].mxu0 }
 0x46a   :  { %v625_v53 = vmul.f32 0.25, %v543_v52  ;;  %v952_v54 = vpop.f32.mrb[5].mxu1  ;;  %v957_v55 = vpop.f32.mrb[5].mxu0 }
 0x46c   :  { %v627_v56 = vsel %vm288_vm3, %v625_v53, -inf }
 0x46d   :  { %v621_v57 = vpop.f32.mrb[6].mxu1  ;;  %628 = vmax.xlane.f32.xlu1 %v627_v56  ;;  %v853_v56 = vld [vmem:[%s1251_s2] sm:$0x3]  ;;  %s1059_s2 = scalar_lea.vmem %s874_s19, 256 }
 0x46e   :  { %v626_v58 = vmul.f32 0.25, %v621_v57  ;;  %v962_v59 = vpop.f32.mrb[7].mxu1  ;;  %p1060_p2 = scmp.ne.s32.totalorder %s874_s19, %s1059_s2  ;;  %p1065_p4 = scmp.lt.s32.totalorder %s1059_s2, %s1059_s2 }
 0x470   :  { %v630_v60 = vsel %vm288_vm3, %v626_v58, -inf  ;;  %p1066_p5 = por %p1065_p4, %p1064_p3 }
 0x471   :  { %631 = vmax.xlane.f32.xlu0 %v630_v60 }
 0x472   :  { %p1067_p6 = pnand %p1066_p5, %p1060_p2 }
 0x487   :  { %731 = vrot.lane.b32.xlu0 %v1159_v9, %s1097_s13 }
 0x48b   :  { %817 = vrot.lane.b32.xlu0 %v1161_v10, %s1098_s14 }
 0x4fa   :  { %v629_v61 = vpop.xlane.xlu1 %628 }
 0x4fb   :  { %v633_v62 = vsub.f32 %v625_v53, %v629_v61 }
 0x4fd   :  { %v635_v63 = vmul.f32 1.442695, %v633_v62 }
 0x4fe   :  { %v632_v0 = vpop.xlane.xlu0 %631 }
 0x4ff   :  { %1003 = vpow2.f32 %v635_v63  ;;  %v634_v1 = vsub.f32 %v626_v58, %v632_v0 }
 0x501   :  { %v637_v2 = vmul.f32 1.442695, %v634_v1 }
 0x502   :  { %v732_v3 = vpop.permute.xlu0 %731 }
 0x503   :  { %1005 = vpow2.f32 %v637_v2  ;;  %969 = vmatpush3.msra.mxu1 %v732_v3 }
 0x506   :  { %v818_v27 = vpop.permute.xlu0 %817 }
 0x509   :  { %v1004_v4 = vpop.eup %1003 }
 0x50a   :  { %v639_v5 = vsel %vm288_vm3, %v1004_v4, 0.0 }
 0x50b   :  { %640 = vadd.xlane.f32.xlu1 %v639_v5 }
 0x50d   :  { %v1006_v6 = vpop.eup %1005 }
 0x50e   :  { %v642_v7 = vsel %vm288_vm3, %v1006_v6, 0.0 }
 0x50f   :  { %643 = vadd.xlane.f32.xlu1 %v642_v7 }
 0x520   :  { %655 = vrot.lane.b32.xlu1 %v1161_v10, %s1097_s13 }
 0x598   :  { %v641_v8 = vpop.xlane.xlu1 %640 }
 0x599   :  { %1007 = vrcp.f32 %v641_v8 }
 0x59c   :  { %v644_v11 = vpop.xlane.xlu1 %643 }
 0x59d   :  { %1009 = vrcp.f32 %v644_v11 }
 0x5a0   :  { %v656_v12 = vpop.permute.xlu1 %655 }
 0x5a1   :  { %964 = vmatpush3.msra.mxu0 %v656_v12 }
 0x5a3   :  { %v1008_v13 = vpop.eup %1007 }
 0x5a4   :  { %v647_v14 = vmul.f32 %v1008_v13, %v641_v8 }
 0x5a6   :  { %v649_v15 = vsub.f32 2.0, %v647_v14 }
 0x5a7   :  { %v1010_v16 = vpop.eup %1009 }
 0x5a8   :  { %v651_v17 = vmul.f32 %v1008_v13, %v649_v15  ;;  %v648_v18 = vmul.f32 %v1010_v16, %v644_v11 }
 0x5aa   :  { %v653_v19 = vmul.f32 %v1004_v4, %v651_v17  ;;  %v650_v20 = vsub.f32 2.0, %v648_v18 }
 0x5ac   :  { %v652_v21 = vmul.f32 %v1010_v16, %v650_v20  ;;  %966 = vmatmul.mubr.msk.f32.vlgmr.msra.gmra.mrb[6].mxu0 %vm288_vm3, %v653_v19 }
 0x5ae   :  { %v654_v22 = vmul.f32 %v1006_v6, %v652_v21 }
 0x5b0   :  { %971 = vmatmul.mubr.msk.f32.vlgmr.msra.gmra.mrb[8].mxu1 %vm288_vm3, %v654_v22 }
 0x67f   :  { %v727_v10 = vpop.f32.mrb[6].mxu0 }
 0x680   :  { %809 = vrot.lane.b32.xlu1 %v727_v10, %s1099_s15  ;;  %v967_v23 = vpop.f32.mrb[7].mxu0 }
 0x683   :  { %v803_v24 = vpop.f32.mrb[8].mxu1 }
 0x684   :  { %811 = vrot.lane.b32.xlu1 %v803_v24, %s1099_s15  ;;  %v972_v25 = vpop.f32.mrb[9].mxu1 }
 0x688   :  { %819 = vrot.lane.b32.xlu1 %v1159_v9, %s1098_s14 }
 0x6f2   :  { %v810_v26 = vpop.permute.xlu1 %809 }
 0x6f3   :  { %v815_v28 = vsel %vm134_vm2, %v1205_v49, %v810_v26  ;;  %v854_v49 = vlaneseq }
 0x6f4   :  { %v823_v29 = vadd.f32 %v818_v27, %v815_v28 }
 0x6f6   :  { %v812_v30 = vpop.permute.xlu1 %811  ;;  %v825_v31 = vmax.f32 %v823_v29, 0.0 }
 0x6f7   :  { %v816_v33 = vsel %vm134_vm2, %v1207_v51, %v812_v30  ;;  %v855_v51 = vshrl.u32 %v854_v49, 7 }
 0x6f8   :  { %v827_v32 = vsel %vm49_vm0, %v825_v31, 0.0 }
 0x6f9   :  { %828 = vadd.xlane.f32.xlu0 %v827_v32  ;;  %v856_v55 = vsub.s32 0, %v855_v51  ;;  %v862_v57 = vsub.s32 1, %v855_v51 }
 0x6fa   :  { %v820_v34 = vpop.permute.xlu1 %819 }
 0x6fb   :  { %v824_v35 = vadd.f32 %v820_v34, %v816_v33  ;;  %v857_v58 = vrot.slane %v853_v56, %v856_v55  ;;  %v863_v61 = vrot.slane %v853_v56, %v862_v57 }
 0x6fd   :  { %v826_v36 = vmax.f32 %v824_v35, 0.0 }
 0x6ff   :  { %v830_v37 = vsel %vm49_vm0, %v826_v36, 0.0 }
 0x700   :  { %831 = vadd.xlane.f32.xlu1 %v830_v37 }
 0x786   :  { %v829_v9 = vpop.xlane.xlu0 %828 }
 0x787   :  { %v833_v38 = vmul.f32 0.03125, %v829_v9 }
 0x789   :  { %v835_v39 = vsub.f32 %v825_v31, %v833_v38 }
 0x78b   :  { %v837_v40 = vmul.f32 %v835_v39, %v835_v39 }
 0x78d   :  { %v832_v41 = vpop.xlane.xlu1 %831  ;;  %v839_v42 = vsel %vm49_vm0, %v837_v40, 0.0 }
 0x78e   :  { %v834_v43 = vmul.f32 0.03125, %v832_v41  ;;  %840 = vadd.xlane.f32.xlu0 %v839_v42 }
 0x790   :  { %v836_v44 = vsub.f32 %v826_v36, %v834_v43 }
 0x792   :  { %v838_v45 = vmul.f32 %v836_v44, %v836_v44 }
 0x794   :  { %v842_v46 = vsel %vm49_vm0, %v838_v45, 0.0 }
 0x795   :  { %843 = vadd.xlane.f32.xlu0 %v842_v46 }
 0x81b   :  { %v841_v47 = vpop.xlane.xlu0 %840 }
 0x81c   :  { %v845_v48 = vmul.f32 0.03125, %v841_v47 }
 0x81e   :  { %v847_v50 = vadd.f32 1e-06, %v845_v48 }
 0x820   :  { %1011 = vrsqrt.f32 %v847_v50 }
 0x822   :  { %v844_v52 = vpop.xlane.xlu0 %843 }
 0x823   :  { %v846_v53 = vmul.f32 0.03125, %v844_v52 }
 0x825   :  { %v848_v54 = vadd.f32 1e-06, %v846_v53 }
 0x827   :  { %1013 = vrsqrt.f32 %v848_v54 }
 0x82a   :  { %v1012_v59 = vpop.eup %1011 }
 0x82b   :  { %v851_v60 = vmul.f32 %v1012_v59, %v835_v39 }
 0x82d   :  { %v858_v62 = vmul.f32 %v857_v58, %v851_v60 }
 0x82f   :  { %v864_v63 = vadd.f32 %v863_v61, %v858_v62 }
 0x831   :  { %v1014_v0 = vpop.eup %1013  ;;  %866 = vst.msk [vmem:[#allocation7] sm:$0xff] %vm49_vm0, %v864_v63 }
 0x832   :  { %v852_v1 = vmul.f32 %v1014_v0, %v836_v44 }
 0x834   :  { %v859_v2 = vmul.f32 %v857_v58, %v852_v1 }
 0x836   :  { %v865_v3 = vadd.f32 %v863_v61, %v859_v2 }
 0x838   :  { %867 = vst.msk [vmem:[#allocation7 + $0x8] sm:$0xff] %vm49_vm0, %v865_v3 }
 0x839   :  { %1070 = shalt.err (!%p1067_p6)
}
 0x83a   :  { %s1071_s24 = scalar_lea.hbm %s1252_s3, 256 }
 0x83b   :  { %p1072_p7 = scmp.ne.s32.totalorder %s1252_s3, %s1071_s24  ;;  %p1075_p8 = scmp.lt.u32.totalorder %s1071_s24, %s1252_s3 }
 0x83d   :  { %p1077_p9 = pnand %p1075_p8, %p1072_p7 }
 0x83f   :  { %1080 = shalt.err (!%p1077_p9)
}
 0x840   :  { %879 = dma.vmem_to_hbm [thread:$0]  %s874_s19, 256, %s1252_s3, [#allocation4], %s1088_s22, %s1088_s22, %s1089_s23  }
 0x841   :  { %1085 = dma.done.wait [#allocation4], 256  }
 0x842   :  { %1086 = vsyncadd [#allocation4], 4294967040 }
 0x843   :  { %883 = vsyncpa [#allocation3], 1 }
 0x844   :  { %884 = vsyncpa [#allocation6], 1 }
 0x845   :  { %885 = vsyncpa [#allocation4], 1 }

</bundles_post_ra>
